<compile_context>
chip_gen: v6e
topology: v6e:2x2x1
jax: 0.10.0
libtpu: 0.0.40
codegen_flags: <defaults>
</compile_context>

<pallas_src>
import numpy as np
import jax
import jax.numpy as jnp
from jax.experimental import pallas as pl
from jax.experimental.pallas import tpu as pltpu


def _round_up(n, m):
    return ((n + m - 1) // m) * m


def _make_embed_kernel(num_numerical, C, V):
    """Kernel closed over the static column/table geometry."""

    def kernel(x_ref, tab_ref, out_ref):
        x = x_ref[...]                                        # (B_tile, F) f32
        bt = x.shape[0]

        # Round before the int cast to guard against float noise (4.9999997).
        idx = jnp.round(x[:, num_numerical:]).astype(jnp.int32)    # (B_tile, C)

        # One combined one-hot: column c occupies lanes [c*V, (c+1)*V).
        iota_v = jax.lax.broadcasted_iota(jnp.int32, (bt, V), 1)
        onehot = jnp.concatenate(
            [(idx[:, c:c + 1] == iota_v).astype(jnp.float32) for c in range(C)],
            axis=1)                                           # (B_tile, C*V)

        # Single wide MXU matmul against the block-diagonal table: every
        # column's embedding lands at its final (already lane-padded) offset.
        emb = jnp.dot(onehot, tab_ref[...],
                      preferred_element_type=jnp.float32)     # (B_tile, total_pad - nn)

        # Exactly one lane-dense store of the full output slab.
        if num_numerical > 0:
            out_ref[...] = jnp.concatenate([x[:, :num_numerical], emb], axis=1)
        else:
            out_ref[...] = emb

    return kernel


def embed_forward(x, tables, num_numerical):
    """Forward pass of Embed.

    x:       [B, F] float32, F = num_numerical + C (cat values stored as floats)
    tables:  [C, V, E] float32 stacked, zero-padded embedding tables
    returns: [B, num_numerical + C * E] float32
    """
    B, F = x.shape
    C, V, E = tables.shape
    assert F == num_numerical + C

    if C == 0:
        # len(categorical) == 0 branch of the module: identity.
        return x

    total = num_numerical + C * E
    total_pad = _round_up(total, 128)                 # lane-dense output slab
    ce_pad = total_pad - num_numerical

    # Block-diagonal table with each column's table pre-placed at its final
    # output column offset (built once here; cache it in a real model).
    blockdiag = jnp.zeros((C * V, ce_pad), jnp.float32)
    for c in range(C):
        blockdiag = blockdiag.at[c * V:(c + 1) * V, c * E:(c + 1) * E].set(
            tables[c].astype(jnp.float32))

    # Batch tiling: big tiles (per-grid-step overhead ~0.35us), but keep >= 2
    # tiles for large batches so both v7x TensorCores get work.
    if B >= 1024:
        B_tile = 512
    elif B > 512:
        B_tile = _round_up((B + 1) // 2, 8)
    else:
        B_tile = _round_up(B, 8)
    B_pad = _round_up(B, B_tile)
    x_p = jnp.pad(x, ((0, B_pad - B), (0, 0))) if B_pad != B else x

    grid = (B_pad // B_tile,)

    # VMEM budget: double-buffered x/out blocks + one resident table copy.
    vmem_bytes = (2 * B_tile * F * 4 + 2 * B_tile * total_pad * 4
                  + blockdiag.size * 4 + (2 << 20))
    vmem_limit = int(min(max(vmem_bytes, 32 << 20), 64 << 20))

    out = pl.pallas_call(
        _make_embed_kernel(num_numerical, C, V),
        out_shape=jax.ShapeDtypeStruct((B_pad, total_pad), jnp.float32),
        grid_spec=pltpu.PrefetchScalarGridSpec(
            num_scalar_prefetch=0,
            grid=grid,
            in_specs=[
                pl.BlockSpec((B_tile, F), lambda b: (b, 0)),
                # Whole block-diagonal table resident in VMEM, unblocked:
                # one copy, no double-buffering of a constant-index block.
                pl.BlockSpec(memory_space=pltpu.MemorySpace.VMEM),
            ],
            out_specs=pl.BlockSpec((B_tile, total_pad), lambda b: (b, 0)),
        ),
        compiler_params=pltpu.CompilerParams(
            dimension_semantics=("parallel",),
            vmem_limit_bytes=vmem_limit),
    )(x_p, blockdiag)

    out = out[:, :total]
    return out[:B] if B_pad != B else out


if __name__ == "__main__":
    # Small synthetic setup consistent with the module's __init__:
    # per-categorical-column nunique, numerical columns, emb_dim.
    nuniques = [5, 7, 3]          # per-categorical-column nunique
    num_numerical = 2
    emb_dim = 8
    B = 8
    C = len(nuniques)
    V_max = max(nuniques) + 1     # nn.Embedding(num_emb + 1, emb_dim)

    key = jax.random.PRNGKey(0)
    k_tab, k_num, k_cat = jax.random.split(key, 3)

    # Deterministic embedding tables, zero-padded to the common V_max.
    tab_keys = jax.random.split(k_tab, C)
    tables = []
    for c in range(C):
        vc = nuniques[c] + 1
        t = jax.random.normal(tab_keys[c], (vc, emb_dim), dtype=jnp.float32)
        t = jnp.pad(t, ((0, V_max - vc), (0, 0)))
        tables.append(t)
    tables = jnp.stack(tables, axis=0)                        # [C, V_max, E]

    # Input x: [B, num_numerical + C], cat columns hold integer-valued floats.
    numerical_x = jax.random.normal(k_num, (B, num_numerical), dtype=jnp.float32)
    cat_keys = jax.random.split(k_cat, C)
    cat_cols = [
        jax.random.randint(cat_keys[c], (B, 1), 0, nuniques[c] + 1).astype(jnp.float32)
        for c in range(C)
    ]
    x = jnp.concatenate([numerical_x] + cat_cols, axis=1)     # [B, 2 + 3]

    out = embed_forward(x, tables, num_numerical)
    out = jax.block_until_ready(out)

    # Pure-JAX reference (torch semantics: per-column lookup, concat on dim=1).
    idx_ref_arr = jnp.round(x[:, num_numerical:]).astype(jnp.int32)
    ref_embs = [jnp.take(tables[c], idx_ref_arr[:, c], axis=0) for c in range(C)]
    ref = jnp.concatenate([x[:, :num_numerical]] + ref_embs, axis=1)

    assert out.shape == (B, num_numerical + C * emb_dim), out.shape
    np.testing.assert_allclose(np.asarray(out), np.asarray(ref), rtol=1e-6, atol=1e-6)
    print("KERNEL_OK")
</pallas_src>

<mosaic_0001>
module attributes {stable_mosaic.version = 11 : i64} {
  func.func @kernel(%arg0: i32, %arg1: memref<8x5xf32, #tpu.memory_space<vmem>>, %arg2: memref<24x126xf32, #tpu.memory_space<vmem>>, %arg3: memref<8x128xf32, #tpu.memory_space<vmem>>) attributes {dimension_semantics = [#tpu.dimension_semantics<parallel>], iteration_bounds = array<i64: 1>, scalar_prefetch = 0 : i64, scratch_operands = 0 : i64, tpu.core_type = #tpu.core_type<tc>, window_params = [{transform_indices = @transform_0, window_bounds = array<i64: 8, 5>}, {pipeline_mode = #tpu.pipeline_mode<synchronous>, transform_indices = @transform_1, window_bounds = array<i64: 24, 126>}, {transform_indices = @transform_2, window_bounds = array<i64: 8, 128>}]} {
    %c0 = arith.constant 0 : index
    %c0_0 = arith.constant 0 : index
    %0 = vector.load %arg1[%c0, %c0_0] : memref<8x5xf32, #tpu.memory_space<vmem>>, vector<8x5xf32>
    %1 = vector.extract_strided_slice %0 {offsets = [0, 2], sizes = [8, 3], strides = [1, 1]} : vector<8x5xf32> to vector<8x3xf32>
    %2 = math.roundeven %1 : vector<8x3xf32>
    %3 = arith.fptosi %2 : vector<8x3xf32> to vector<8x3xi32>
    %4 = tpu.iota {dimensions = array<i32: 1>} : vector<8x8xi32>
    %5 = vector.extract_strided_slice %3 {offsets = [0, 0], sizes = [8, 1], strides = [1, 1]} : vector<8x3xi32> to vector<8x1xi32>
    %6 = vector.broadcast %5 : vector<8x1xi32> to vector<8x8xi32>
    %7 = arith.cmpi eq, %6, %4 : vector<8x8xi32>
    %8 = arith.extui %7 : vector<8x8xi1> to vector<8x8xi32>
    %9 = arith.sitofp %8 : vector<8x8xi32> to vector<8x8xf32>
    %10 = vector.extract_strided_slice %3 {offsets = [0, 1], sizes = [8, 1], strides = [1, 1]} : vector<8x3xi32> to vector<8x1xi32>
    %11 = vector.broadcast %10 : vector<8x1xi32> to vector<8x8xi32>
    %12 = arith.cmpi eq, %11, %4 : vector<8x8xi32>
    %13 = arith.extui %12 : vector<8x8xi1> to vector<8x8xi32>
    %14 = arith.sitofp %13 : vector<8x8xi32> to vector<8x8xf32>
    %15 = vector.extract_strided_slice %3 {offsets = [0, 2], sizes = [8, 1], strides = [1, 1]} : vector<8x3xi32> to vector<8x1xi32>
    %16 = vector.broadcast %15 : vector<8x1xi32> to vector<8x8xi32>
    %17 = arith.cmpi eq, %16, %4 : vector<8x8xi32>
    %18 = arith.extui %17 : vector<8x8xi1> to vector<8x8xi32>
    %19 = arith.sitofp %18 : vector<8x8xi32> to vector<8x8xf32>
    %20 = tpu.concatenate %9, %14, %19 in 1 : vector<8x8xf32>, vector<8x8xf32>, vector<8x8xf32> -> vector<8x24xf32>
    %c0_1 = arith.constant 0 : index
    %c0_2 = arith.constant 0 : index
    %21 = vector.load %arg2[%c0_1, %c0_2] : memref<24x126xf32, #tpu.memory_space<vmem>>, vector<24x126xf32>
    %cst = arith.constant dense<0.000000e+00> : vector<8x126xf32>
    %22 = tpu.matmul %20, %21, %cst {dimension_numbers = #tpu.dot_dimension_numbers<[1], [0], [0], [1], [0, 0, 1, 1], [], []>} : vector<8x24xf32>, vector<24x126xf32>, vector<8x126xf32> -> vector<8x126xf32>
    %23 = vector.extract_strided_slice %0 {offsets = [0, 0], sizes = [8, 2], strides = [1, 1]} : vector<8x5xf32> to vector<8x2xf32>
    %24 = tpu.concatenate %23, %22 in 1 : vector<8x2xf32>, vector<8x126xf32> -> vector<8x128xf32>
    %c0_3 = arith.constant 0 : index
    %c0_4 = arith.constant 0 : index
    %25 = vector.load %arg3[%c0_3, %c0_4] : memref<8x128xf32, #tpu.memory_space<vmem>>, vector<8x128xf32>
    tpu.vector_store %arg3[%c0_3, %c0_4], %24 {strides = array<i32>} : memref<8x128xf32, #tpu.memory_space<vmem>>, vector<8x128xf32>,
    return
  }
  func.func @transform_0(%arg0: i32) -> (i32, i32) {
    %c0_i32 = arith.constant 0 : i32
    %c0_i32_0 = arith.constant 0 : i32
    return %arg0, %c0_i32 : i32, i32
  }
  func.func @transform_1(%arg0: i32) -> (i32, i32) {
    %c0_i32 = arith.constant 0 : i32
    %c0_i32_0 = arith.constant 0 : i32
    %c0_i32_1 = arith.constant 0 : i32
    return %c0_i32, %c0_i32_0 : i32, i32
  }
  func.func @transform_2(%arg0: i32) -> (i32, i32) {
    %c0_i32 = arith.constant 0 : i32
    %c0_i32_0 = arith.constant 0 : i32
    return %arg0, %c0_i32 : i32, i32
  }
}

</mosaic_0001>

<bundles_post_ra>
// kernel: tpu_custom_call.1
= control target key start
LH: loop header
LB: loop body
LE: loop exit
PB: predicated region body
PF: predicated region fallthrough
CT: control target
= control target key end

     0   :  { %7 = vsyncpa [#allocation3], 0  ;;  %s311_s0 = inlined_call_operand.hbm [shape: f32[8,5], index: 0, kind: input, shape index: {}]   ;;  %s312_s1 = inlined_call_operand.hbm [shape: f32[24,126], index: 1, kind: input, shape index: {}]   ;;  %s313_s2 = inlined_call_operand.hbm [shape: f32[8,128], index: 2, kind: output, shape index: {}]  }
   0x1   :  { %8 = vsyncpa [#allocation6], 0 }
   0x2   :  { %9 = vsyncpa [#allocation4], 0  ;;  %s273_s9 = smov [#allocation2]   ;;  %s274_s11 = smov [#allocation5]  }
   0x3   :  { %s16_s10 = sshll.u32 %s273_s9, 4  ;;  %s25_s12 = sshll.u32 %s274_s11, 4  ;;  %s17_s10 = int_to_ptr.vmem [resolvable:$true] %s16_s10  ;;  %s26_s12 = int_to_ptr.vmem [resolvable:$true] %s25_s12 }
   0x4   :  { %s215_s13 = scalar_lea.vmem %s17_s10, 128  ;;  %p220_p1 = scmp.lt.s32.totalorder %s17_s10, %s17_s10 }
   0x5   :  { %p216_p0 = scmp.ne.s32.totalorder %s17_s10, %s215_s13  ;;  %p221_p2 = scmp.lt.s32.totalorder %s215_s13, %s215_s13 }
   0x7   :  { %p222_p3 = por %p221_p2, %p220_p1 }
   0x9   :  { %p223_p4 = pnand %p222_p3, %p216_p0 }
   0xb   :  { %226 = shalt.err (!%p223_p4)
}
   0xc   :  { %19 = dma.hbm_to_vmem [thread:$0]  %s311_s0, 128, %s17_s10, [#allocation3]  }
   0xd   :  { %s235_s16 = scalar_lea.vmem %s26_s12, 384  ;;  %p240_p6 = scmp.lt.s32.totalorder %s26_s12, %s26_s12 }
   0xe   :  { %p236_p5 = scmp.ne.s32.totalorder %s26_s12, %s235_s16  ;;  %p241_p7 = scmp.lt.s32.totalorder %s235_s16, %s235_s16 }
  0x10   :  { %p242_p8 = por %p241_p7, %p240_p6 }
  0x12   :  { %p243_p9 = pnand %p242_p8, %p236_p5 }
  0x14   :  { %246 = shalt.err (!%p243_p9)
}
  0x15   :  { %s275_s17 = smov 128   ;;  %s276_s18 = smov 8  }
  0x16   :  { %31 = dma.hbm_to_vmem [thread:$0]  %s312_s1, 384, %s26_s12, [#allocation6], %s275_s17, %s275_s17, %s276_s18  }
  0x17   :  { %267 = dma.done.wait [#allocation3], 128  }
  0x18   :  { %268 = vsyncadd [#allocation3], 4294967168 }
  0x19   :  { %269 = dma.done.wait [#allocation6], 384  }
  0x1a   :  { %270 = vsyncadd [#allocation6], 4294966912  ;;  %v277_v0 = vmov 3   ;;  %v278_v1 = vmov 2   ;;  %v38_v2 = vld [vmem:[#allocation2] sm:$0xff]  ;;  %v279_v3 = vmov 0.0   ;;  %v40_v8 = vlaneseq }
  0x1b   :  { %204 = vset.pattern.permute.xlu0 %v277_v0  ;;  %206 = vset.pattern.permute.xlu1 %v278_v1  ;;  %v191_v4 = vcvt.f32.s32 %v38_v2  ;;  %v280_v5 = vmov 4   ;;  %v74_v6 = vld [vmem:[#allocation5 + $0x10] sm:$0xff]  ;;  %v73_v7 = vld [vmem:[#allocation5 + $0x8] sm:$0xff]  ;;  %v72_v9 = vld [vmem:[#allocation5] sm:$0xff]  ;;  %vm281_vm0 = vmmov 0   ;;  %s282_s0 = smov 16  }
  0x1c   :  { %180 = vmatprep.subr.mxu0 %v279_v3  ;;  %186 = vmatprep.mubr.msk.f32.mxu0 %vm281_vm0, %v279_v3  ;;  %v41_v10 = vand.u32 127, %v40_v8  ;;  %vm68_vm4 = vcmask 64512   ;;  %vm70_vm5 = vcmask 130048   ;;  %vm75_vm6 = vcmask 195584   ;;  %s283_s1 = smov 2   ;;  %s284_s21 = smov [#allocation7]  }
  0x1d   :  { %49 = vperm.xlu0 %204, %v191_v4   ;;  %43 = vperm.xlu1 %206, %v191_v4   ;;  %s162_s22 = sshll.u32 %s284_s21, 4  ;;  %vm153_vm7 = vcmask 15360   ;;  %s163_s22 = int_to_ptr.vmem [resolvable:$true] %s162_s22 }
  0x1e   :  { %181 = vmatpush3.msra.mxu0 %v74_v6  ;;  %s247_s23 = scalar_lea.vmem %s163_s22, 128  ;;  %p252_p11 = scmp.lt.s32.totalorder %s163_s22, %s163_s22 }
  0x1f   :  { %182 = vmatprep.subr.mxu0 %v279_v3  ;;  %p248_p10 = scmp.ne.s32.totalorder %s163_s22, %s247_s23  ;;  %p253_p12 = scmp.lt.s32.totalorder %s247_s23, %s247_s23 }
  0x20   :  { %183 = vmatpush3.msra.mxu0 %v73_v7 }
  0x21   :  { %205 = vset.pattern.permute.xlu0 %v280_v5  ;;  %184 = vmatprep.subr.mxu0 %v279_v3  ;;  %p254_p13 = por %p253_p12, %p252_p11 }
  0x22   :  { %55 = vperm.xlu0 %205, %v191_v4   ;;  %185 = vmatpush3.msra.mxu0 %v72_v9 }
  0x23   :  { %p255_p0 = pnand %p254_p13, %p248_p10 }
  0x98   :  { %v50_v11 = vpop.permute.xlu0 %49  ;;  %v44_v15 = vpop.permute.xlu1 %43 }
  0x99   :  { %vm51_vm1 = vcmp.eq.s32.totalorder %v50_v11, %v41_v10  ;;  %vm45_vm3 = vcmp.eq.s32.totalorder %v44_v15, %v41_v10 }
  0x9a   :  { %v173_v12 = vsel %vm51_vm1, 1.0, %v279_v3  ;;  %v172_v17 = vsel %vm45_vm3, 1.0, %v279_v3 }
  0x9b   :  { %61 = vrot.lane.b32.xlu1 %v173_v12, %s276_s18 }
  0x9d   :  { %v56_v13 = vpop.permute.xlu0 %55 }
  0x9e   :  { %vm57_vm2 = vcmp.eq.s32.totalorder %v56_v13, %v41_v10 }
  0x9f   :  { %v174_v14 = vsel %vm57_vm2, 1.0, %v279_v3 }
  0xa0   :  { %65 = vrot.lane.b32.xlu1 %v174_v14, %s282_s0 }
 0x10d   :  { %v62_v16 = vpop.permute.xlu1 %61 }
 0x10e   :  { %v69_v18 = vsel %vm68_vm4, %v172_v17, %v62_v16 }
 0x112   :  { %v66_v19 = vpop.permute.xlu1 %65 }
 0x113   :  { %v71_v20 = vsel %vm70_vm5, %v69_v18, %v66_v19 }
 0x114   :  { %187 = vmatmul.mubr.msk.f32.vlgmr.msra.gmra.mxu0 %vm75_vm6, %v71_v20 }
 0x1d4   :  { %v145_v21 = vpop.f32.mrf.mxu0 }
 0x1d5   :  { %150 = vrot.lane.b32.xlu0 %v145_v21, %s283_s1 }
 0x1d6   :  { %v188_v22 = vpop.f32.mrf.mxu0 }
 0x247   :  { %v151_v23 = vpop.permute.xlu0 %150 }
 0x248   :  { %v154_v24 = vsel %vm153_vm7, %v38_v2, %v151_v23 }
 0x249   :  { %155 = vst [vmem:[#allocation7] sm:$0xff] %v154_v24 }
 0x24a   :  { %258 = shalt.err (!%p255_p0)
}
 0x24b   :  { %165 = dma.vmem_to_hbm [thread:$0]  %s163_s22, 128, %s313_s2, [#allocation4]  }
 0x24c   :  { %271 = dma.done.wait [#allocation4], 128  }
 0x24d   :  { %272 = vsyncadd [#allocation4], 4294967168 }
 0x24e   :  { %169 = vsyncpa [#allocation3], 1 }
 0x24f   :  { %170 = vsyncpa [#allocation6], 1 }
 0x250   :  { %171 = vsyncpa [#allocation4], 1 }

</bundles_post_ra>
